<compile_context>
chip_gen: v6e
topology: v6e:2x2x1
jax: 0.10.0
libtpu: 0.0.40
codegen_flags: <defaults>
</compile_context>

<pallas_src>
import functools

import jax
import jax.numpy as jnp
import numpy as np
from jax.experimental import pallas as pl
from jax.experimental.pallas import tpu as pltpu


# ---------------------------------------------------------------------------
# Generation-aware VMEM sizing / strip-height selection
# ---------------------------------------------------------------------------
def _vmem_caps():
    """Returns (per-strip working-set budget, scoped vmem_limit_bytes)."""
    cap = 64 * 1024 * 1024                       # conservative default (v7x: 64 MiB)
    try:                                         # v5e/v6e report 128 MiB
        info = pltpu.get_tpu_info()
        cap = int(getattr(info, "vmem_capacity_bytes", cap)) or cap
    except Exception:
        pass
    limit = min(cap * 3 // 4, 112 * 1024 * 1024)
    budget = min(cap // 2, limit - (8 << 20))
    return budget, limit


def _round_up(x, m):
    return ((x + m - 1) // m) * m


def _pick_th(H, align, fixed_bytes, row_bytes, budget, prefer_even_count=False):
    """Largest strip height TH with H % TH == 0, TH % align == 0 that fits."""
    cands = [d for d in range(align, H + 1) if H % d == 0 and d % align == 0]
    if not cands:
        raise NotImplementedError(f"image height {H} must be divisible by {align}")
    fit = [d for d in cands if fixed_bytes + d * row_bytes <= budget] or [min(cands)]
    th = max(fit)
    if prefer_even_count:                        # v7x: keep 2 TensorCores balanced
        even = [d for d in fit if (H // d) % 2 == 0 and 2 * d >= th]
        if even:
            th = max(even)
    return th


def _halo_specs(H, W, C, TH, pad):
    """Center strip + pad-row halo strips above/below (clamped at the edges)."""
    nb = H // pad
    k = TH // pad
    top = pl.BlockSpec((1, pad, W, C),
                       lambda n, i: (n, jnp.maximum(i * k - 1, 0), 0, 0))
    mid = pl.BlockSpec((1, TH, W, C), lambda n, i: (n, i, 0, 0))
    bot = pl.BlockSpec((1, pad, W, C),
                       lambda n, i: (n, jnp.minimum((i + 1) * k, nb - 1), 0, 0))
    return top, mid, bot


def _kw_band(x, kw, w_out):
    """(R, w_out, kw*C): the kw column taps folded into the lane (K) dim."""
    r, _, c = x.shape
    return jnp.concatenate(
        [jax.lax.slice(x, (0, dx, 0), (r, dx + w_out, c)) for dx in range(kw)],
        axis=-1)


# ---------------------------------------------------------------------------
# Kernel 1: conv1 as a plain matmul (im2col done once in XLA) + bias + relu
# ---------------------------------------------------------------------------
def _matmul_act_kernel(x_ref, w_ref, b_ref, o_ref, *, TH, W):
    K = x_ref.shape[-1]
    C = o_ref.shape[-1]
    x2 = x_ref[0].reshape(TH * W, K)
    y = jnp.dot(x2, w_ref[...], preferred_element_type=jnp.float32) + b_ref[...]
    o_ref[0] = jnp.maximum(y, 0.0).reshape(TH, W, C).astype(o_ref.dtype)


def conv9x9_in(x, w, b, *, cd, out_dtype):
    """conv1: 9x9, Cin=3 -> 64, relu.  The tiny 3-channel input is im2col'ed once
    in XLA so the kernel sees a lane-dense K=243 operand (no 3-lane shuffles)."""
    N, H, W, cin = x.shape
    KH, KW, _, cout = w.shape
    pad = (KH - 1) // 2
    xp = jnp.pad(x, ((0, 0), (pad, pad), (pad, pad), (0, 0)))
    xcol = jnp.concatenate(
        [jax.lax.slice(xp, (0, dy, dx, 0), (N, dy + H, dx + W, cin))
         for dy in range(KH) for dx in range(KW)], axis=-1).astype(cd)
    K = KH * KW * cin
    wf = w.reshape(K, cout).astype(cd)
    bf = b.reshape(1, cout).astype(jnp.float32)

    cdb = jnp.dtype(cd).itemsize
    odb = jnp.dtype(out_dtype).itemsize
    budget, limit = _vmem_caps()
    row = W * (K * cdb * 3 + cout * (4 + 2 * odb))
    TH = _pick_th(H, 1, 1 << 20, row, budget, prefer_even_count=(N % 2 == 1))
    S = H // TH

    kernel = functools.partial(_matmul_act_kernel, TH=TH, W=W)
    return pl.pallas_call(
        kernel,
        out_shape=jax.ShapeDtypeStruct((N, H, W, cout), out_dtype),
        grid_spec=pltpu.PrefetchScalarGridSpec(
            num_scalar_prefetch=0,
            grid=(N, S),
            in_specs=[pl.BlockSpec((1, TH, W, K), lambda n, i: (n, i, 0, 0)),
                      pl.BlockSpec((K, cout), lambda n, i: (0, 0)),
                      pl.BlockSpec((1, cout), lambda n, i: (0, 0))],
            out_specs=pl.BlockSpec((1, TH, W, cout), lambda n, i: (n, i, 0, 0))),
        compiler_params=pltpu.CompilerParams(
            dimension_semantics=("parallel", "parallel"),
            vmem_limit_bytes=limit),
    )(xcol, wf, bf)


# ---------------------------------------------------------------------------
# Kernel 2: fused double 3x3 conv  relu(conv_b(relu(conv_a(x)))) [+ x]
#           (used for the 4 residual blocks and for the fused conv2+conv3)
# ---------------------------------------------------------------------------
def _dconv_kernel(x_top, x_mid, x_bot, wa_ref, ba_ref, wb_ref, bb_ref,
                  o_ref, xs_ref, *, TH, W, WA, S, residual, cd):
    i = pl.program_id(1)
    C = x_mid.shape[-1]
    R = TH + 4                               # input rows: 2-row halo each side

    # ---- zero-padded input window in VMEM scratch (compute dtype) ----------
    # (side columns are narrow; rewritten every step so each core's scratch is
    #  always valid under the ("parallel","parallel") grid partitioning)
    xs_ref[:, 0:2, :] = jnp.zeros((R, 2, C), cd)
    xs_ref[:, 2 + W:WA + 2, :] = jnp.zeros((R, WA - W, C), cd)
    zrows = jnp.zeros((2, W, C), cd)

    @pl.when(i == 0)
    def _():
        xs_ref[0:2, 2:2 + W, :] = zrows

    @pl.when(i > 0)
    def _():
        xs_ref[0:2, 2:2 + W, :] = x_top[0].astype(cd)

    @pl.when(i == S - 1)
    def _():
        xs_ref[R - 2:R, 2:2 + W, :] = zrows

    @pl.when(i < S - 1)
    def _():
        xs_ref[R - 2:R, 2:2 + W, :] = x_bot[0].astype(cd)

    xs_ref[2:2 + TH, 2:2 + W, :] = x_mid[0].astype(cd)

    # ---- conv_a on an extended (TH+2, WA) region (WA % 8 == 0): one matmul,
    #      KW folded into K (=3C), KH folded into N (=3C), row-shifted combine.
    pa = _kw_band(xs_ref[...], 3, WA).reshape(R * WA, 3 * C)
    qa = jnp.dot(pa, wa_ref[...], preferred_element_type=jnp.float32)
    MA = (TH + 2) * WA
    a = (qa[0:MA, 0:C] + qa[WA:WA + MA, C:2 * C]
         + qa[2 * WA:2 * WA + MA, 2 * C:3 * C])
    a = jnp.maximum(a + ba_ref[...], 0.0).reshape(TH + 2, WA, C)

    # conv_b must see ZERO padding (not conv_a values) outside the image.
    rr = jax.lax.broadcasted_iota(jnp.int32, (TH + 2, WA, 1), 0)
    ccol = jax.lax.broadcasted_iota(jnp.int32, (TH + 2, WA, 1), 1)
    keep = (ccol >= 1) & (ccol <= W)
    keep = keep & ((rr >= 1) | (i > 0))
    keep = keep & ((rr <= TH) | (i < S - 1))
    tmp = jnp.where(keep, a, 0.0).astype(cd)        # intermediate stays in VMEM

    # ---- conv_b (+bias+relu) and optional residual add ----------------------
    pb = _kw_band(tmp, 3, W).reshape((TH + 2) * W, 3 * C)
    qb = jnp.dot(pb, wb_ref[...], preferred_element_type=jnp.float32)
    MB = TH * W
    out = (qb[0:MB, 0:C] + qb[W:W + MB, C:2 * C]
           + qb[2 * W:2 * W + MB, 2 * C:3 * C])
    out = jnp.maximum(out + bb_ref[...], 0.0)
    if residual:
        out = out + x_mid[0].reshape(MB, C).astype(jnp.float32)
    o_ref[0] = out.reshape(TH, W, C).astype(o_ref.dtype)


def double_conv3x3(x, wa, ba, wb, bb, *, residual, cd, out_dtype):
    """Fused relu(conv3x3_b(relu(conv3x3_a(x)))) [+ x] as ONE pallas_call."""
    N, H, W, C = x.shape
    if H % 2:
        raise NotImplementedError("H must be even")
    WA = _round_up(W + 2, 8)                 # conv_a working width (layout-aligned)
    cdb = jnp.dtype(cd).itemsize
    budget, limit = _vmem_caps()
    row = ((WA + 2) * 128 * cdb              # window scratch (lanes padded to 128)
           + W * C * cdb * 4                 # in(mid)+out blocks, double buffered
           + WA * 3 * C * (cdb + 4)          # conv_a patch + f32 matmul result
           + WA * C * (4 + cdb)              # conv_a activation + cd intermediate
           + W * 3 * C * (cdb + 4)           # conv_b patch + f32 matmul result
           + W * C * 4)                      # output accumulator
    fixed = 4 * row + 2 * (3 * C) * (3 * C) * cdb + (2 << 20)
    TH = _pick_th(H, 2, fixed, row, budget, prefer_even_count=(N % 2 == 1))
    S = H // TH

    # Wx[dx*C+ci, dy*C+co] = w[dy, dx, ci, co]   (KW -> K, KH -> N)
    wa_f = jnp.transpose(wa, (1, 2, 0, 3)).reshape(3 * C, 3 * C).astype(cd)
    wb_f = jnp.transpose(wb, (1, 2, 0, 3)).reshape(3 * C, 3 * C).astype(cd)
    ba_f = ba.reshape(1, C).astype(jnp.float32)
    bb_f = bb.reshape(1, C).astype(jnp.float32)

    top, mid, bot = _halo_specs(H, W, C, TH, 2)
    kernel = functools.partial(_dconv_kernel, TH=TH, W=W, WA=WA, S=S,
                               residual=residual, cd=cd)
    return pl.pallas_call(
        kernel,
        out_shape=jax.ShapeDtypeStruct((N, H, W, C), out_dtype),
        grid_spec=pltpu.PrefetchScalarGridSpec(
            num_scalar_prefetch=0,
            grid=(N, S),
            in_specs=[top, mid, bot,
                      pl.BlockSpec((3 * C, 3 * C), lambda n, i: (0, 0)),
                      pl.BlockSpec((1, C), lambda n, i: (0, 0)),
                      pl.BlockSpec((3 * C, 3 * C), lambda n, i: (0, 0)),
                      pl.BlockSpec((1, C), lambda n, i: (0, 0))],
            out_specs=pl.BlockSpec((1, TH, W, C), lambda n, i: (n, i, 0, 0)),
            scratch_shapes=[pltpu.VMEM((TH + 4, WA + 2, C), cd)]),
        compiler_params=pltpu.CompilerParams(
            dimension_semantics=("parallel", "parallel"),
            vmem_limit_bytes=limit),
    )(x, x, x, wa_f, ba_f, wb_f, bb_f)


# ---------------------------------------------------------------------------
# Kernel 3: conv4 (9x9, 64 -> 3) + tanh, emitting lane-dense flat NCHW
# ---------------------------------------------------------------------------
def _conv9_out_kernel(x_top, x_mid, x_bot, w_ref, b_ref, o_ref, xs_ref, *,
                      TH, W, S, nchw, cd):
    i = pl.program_id(1)
    C = x_mid.shape[-1]          # 64
    cout = w_ref.shape[1]        # 3
    R = TH + 8

    xs_ref[:, 0:4, :] = jnp.zeros((R, 4, C), cd)
    xs_ref[:, 4 + W:W + 8, :] = jnp.zeros((R, 4, C), cd)
    z4 = jnp.zeros((4, W, C), cd)

    @pl.when(i == 0)
    def _():
        xs_ref[0:4, 4:4 + W, :] = z4

    @pl.when(i > 0)
    def _():
        xs_ref[0:4, 4:4 + W, :] = x_top[0].astype(cd)

    @pl.when(i == S - 1)
    def _():
        xs_ref[R - 4:R, 4:4 + W, :] = z4

    @pl.when(i < S - 1)
    def _():
        xs_ref[R - 4:R, 4:4 + W, :] = x_bot[0].astype(cd)

    xs_ref[4:4 + TH, 4:4 + W, :] = x_mid[0].astype(cd)

    # KW taps folded into K (=9*64); one transposed matmul per KH tap row
    # accumulating straight into a lane-dense (Cout, TH*W) NCHW slab.
    p = _kw_band(xs_ref[...], 9, W)                           # (R, W, 9*C)
    M = TH * W
    acc = jnp.zeros((cout, M), jnp.float32)
    for dy in range(9):
        pd = jax.lax.slice(p, (dy, 0, 0), (dy + TH, W, 9 * C)).reshape(M, 9 * C)
        acc = acc + jax.lax.dot_general(
            w_ref[dy], pd, (((1,), (1,)), ((), ())),
            preferred_element_type=jnp.float32)
    out = jnp.tanh(acc + b_ref[...])
    if nchw:
        o_ref[0] = out.astype(o_ref.dtype)                    # (Cout, TH*W)
    else:
        o_ref[0] = out.T.reshape(TH, W, cout).astype(o_ref.dtype)


def conv9x9_out(x, w, b, *, cd, out_dtype=jnp.float32):
    N, H, W, C = x.shape
    KH, KW, _, cout = w.shape
    if H % 4:
        raise NotImplementedError("H must be divisible by 4")
    cdb = jnp.dtype(cd).itemsize
    budget, limit = _vmem_caps()
    row = ((W + 8) * 128 * cdb + W * C * cdb * 2
           + W * 9 * C * cdb * 2 + W * cout * 4 * 3)
    fixed = 8 * row + 9 * cout * 9 * C * cdb + (2 << 20)
    TH = _pick_th(H, 4, fixed, row, budget, prefer_even_count=(N % 2 == 1))
    S = H // TH
    nchw = (S == 1) or ((TH * W) % 128 == 0)     # lane-dense flat NCHW emit

    # wf[dy, co, dx*C+ci] = w[dy, dx, ci, co]
    wf = jnp.transpose(w, (0, 3, 1, 2)).reshape(KH, cout, KW * C).astype(cd)
    bf = b.reshape(cout, 1).astype(jnp.float32)

    if nchw:
        out_shape = jax.ShapeDtypeStruct((N, cout, H * W), out_dtype)
        out_spec = pl.BlockSpec((1, cout, TH * W), lambda n, i: (n, 0, i))
    else:
        out_shape = jax.ShapeDtypeStruct((N, H, W, cout), out_dtype)
        out_spec = pl.BlockSpec((1, TH, W, cout), lambda n, i: (n, i, 0, 0))

    top, mid, bot = _halo_specs(H, W, C, TH, 4)
    kernel = functools.partial(_conv9_out_kernel, TH=TH, W=W, S=S,
                               nchw=nchw, cd=cd)
    y = pl.pallas_call(
        kernel,
        out_shape=out_shape,
        grid_spec=pltpu.PrefetchScalarGridSpec(
            num_scalar_prefetch=0,
            grid=(N, S),
            in_specs=[top, mid, bot,
                      pl.BlockSpec((KH, cout, KW * C), lambda n, i: (0, 0, 0)),
                      pl.BlockSpec((cout, 1), lambda n, i: (0, 0))],
            out_specs=out_spec,
            scratch_shapes=[pltpu.VMEM((TH + 8, W + 8, C), cd)]),
        compiler_params=pltpu.CompilerParams(
            dimension_semantics=("parallel", "parallel"),
            vmem_limit_bytes=limit),
    )(x, x, x, wf, bf)
    if nchw:
        return y.reshape(N, cout, H, W)
    return jnp.transpose(y, (0, 3, 1, 2))


# ---------------------------------------------------------------------------
# DPED: parameter init + forward
# ---------------------------------------------------------------------------
def _init_conv(key, kh, kw, cin, cout):
    wk, bk = jax.random.split(key)
    fan_in = kh * kw * cin
    w = jax.random.normal(wk, (kh, kw, cin, cout), jnp.float32) / np.sqrt(fan_in)
    b = 0.01 * jax.random.normal(bk, (cout,), jnp.float32)
    return w, b


def init_dped_params(key, out_channels=64):
    keys = jax.random.split(key, 12)
    p = {"conv1": _init_conv(keys[0], 9, 9, 3, out_channels)}
    for i in range(4):
        p[f"block{i + 1}_conv1"] = _init_conv(keys[1 + 2 * i], 3, 3, 64, 64)
        p[f"block{i + 1}_conv2"] = _init_conv(keys[2 + 2 * i], 3, 3, 64, 64)
    p["conv2"] = _init_conv(keys[9], 3, 3, 64, 64)
    p["conv3"] = _init_conv(keys[10], 3, 3, 64, 64)
    p["conv4"] = _init_conv(keys[11], 9, 9, 64, 3)
    return p


def dped_forward(x_nchw, params, compute_dtype=jnp.float32):
    """compute_dtype selects matmul-operand and inter-layer activation dtype
    (f32 for strict parity, bf16 for the MXU-native path); accumulation is f32."""
    cd = compute_dtype
    x = jnp.transpose(x_nchw, (0, 2, 3, 1)).astype(jnp.float32)    # NCHW -> NHWC
    h = conv9x9_in(x, *params["conv1"], cd=cd, out_dtype=cd)
    for i in range(1, 5):                                          # residual blocks
        wa, ba = params[f"block{i}_conv1"]
        wb, bb = params[f"block{i}_conv2"]
        h = double_conv3x3(h, wa, ba, wb, bb, residual=True, cd=cd, out_dtype=cd)
    # conv2+relu+conv3+relu fused into a single pallas_call (one less HBM trip)
    h = double_conv3x3(h, *params["conv2"], *params["conv3"],
                       residual=False, cd=cd, out_dtype=cd)
    return conv9x9_out(h, *params["conv4"], cd=cd, out_dtype=jnp.float32)


# ---------------------------------------------------------------------------
# Pure-JAX reference (correctness check only)
# ---------------------------------------------------------------------------
def _conv_ref(x, w, b, padding):
    y = jax.lax.conv_general_dilated(
        x, w, window_strides=(1, 1),
        padding=[(padding, padding), (padding, padding)],
        dimension_numbers=("NHWC", "HWIO", "NHWC"))
    return y + b


def dped_forward_ref(x_nchw, params):
    x = jnp.transpose(x_nchw, (0, 2, 3, 1))
    h = jax.nn.relu(_conv_ref(x, *params["conv1"], 4))
    for i in range(1, 5):
        a = jax.nn.relu(_conv_ref(h, *params[f"block{i}_conv1"], 1))
        a = jax.nn.relu(_conv_ref(a, *params[f"block{i}_conv2"], 1))
        h = a + h
    h = jax.nn.relu(_conv_ref(h, *params["conv2"], 1))
    h = jax.nn.relu(_conv_ref(h, *params["conv3"], 1))
    h = jnp.tanh(_conv_ref(h, *params["conv4"], 4))
    return jnp.transpose(h, (0, 3, 1, 2))


if __name__ == "__main__":
    key = jax.random.PRNGKey(0)
    pkey, xkey = jax.random.split(key)

    params = init_dped_params(pkey)
    x = jax.random.normal(xkey, (2, 3, 16, 16), jnp.float32)   # NCHW like PyTorch

    ref = jax.block_until_ready(dped_forward_ref(x, params))

    # Strict structural parity: f32 matmul operands vs XLA conv reference.
    out = jax.block_until_ready(dped_forward(x, params, jnp.float32))
    assert out.shape == (2, 3, 16, 16), out.shape
    err = float(jnp.max(jnp.abs(out - ref)))
    assert err < 2e-3, f"f32 max abs error vs reference: {err}"

    # bf16 operand + bf16 inter-layer storage path (MXU-native).  Loose bound:
    # bf16 rounding compounds over 12 conv layers; strict parity is the f32 run.
    out_bf = jax.block_until_ready(dped_forward(x, params, jnp.bfloat16))
    err_bf = float(jnp.max(jnp.abs(out_bf - ref)))
    assert err_bf < 5e-1, f"bf16 max abs error vs reference: {err_bf}"

    print("KERNEL_OK")
</pallas_src>

<mosaic_0001>
module attributes {stable_mosaic.version = 11 : i64} {
  func.func @_matmul_act_kernel(%arg0: i32, %arg1: i32, %arg2: memref<1x16x16x243xf32, #tpu.memory_space<vmem>>, %arg3: memref<243x64xf32, #tpu.memory_space<vmem>>, %arg4: memref<1x64xf32, #tpu.memory_space<vmem>>, %arg5: memref<1x16x16x64xf32, #tpu.memory_space<vmem>>) attributes {dimension_semantics = [#tpu.dimension_semantics<parallel>, #tpu.dimension_semantics<parallel>], iteration_bounds = array<i64: 2, 1>, scalar_prefetch = 0 : i64, scratch_operands = 0 : i64, tpu.core_type = #tpu.core_type<tc>, window_params = [{transform_indices = @transform_0, window_bounds = array<i64: 1, 16, 16, 243>}, {pipeline_mode = #tpu.pipeline_mode<synchronous>, transform_indices = @transform_1, window_bounds = array<i64: 243, 64>}, {pipeline_mode = #tpu.pipeline_mode<synchronous>, transform_indices = @transform_2, window_bounds = array<i64: 1, 64>}, {transform_indices = @transform_3, window_bounds = array<i64: 1, 16, 16, 64>}]} {
    %c0 = arith.constant 0 : index
    %c0_0 = arith.constant 0 : index
    %c0_1 = arith.constant 0 : index
    %c0_2 = arith.constant 0 : index
    %0 = vector.load %arg2[%c0, %c0_0, %c0_1, %c0_2] : memref<1x16x16x243xf32, #tpu.memory_space<vmem>>, vector<1x16x16x243xf32>
    %1 = vector.shape_cast %0 : vector<1x16x16x243xf32> to vector<16x16x243xf32>
    %2 = vector.shape_cast %1 : vector<16x16x243xf32> to vector<256x243xf32>
    %c0_3 = arith.constant 0 : index
    %c0_4 = arith.constant 0 : index
    %3 = vector.load %arg3[%c0_3, %c0_4] : memref<243x64xf32, #tpu.memory_space<vmem>>, vector<243x64xf32>
    %cst = arith.constant dense<0.000000e+00> : vector<256x64xf32>
    %4 = tpu.matmul %2, %3, %cst {dimension_numbers = #tpu.dot_dimension_numbers<[1], [0], [0], [1], [0, 0, 1, 1], [], []>} : vector<256x243xf32>, vector<243x64xf32>, vector<256x64xf32> -> vector<256x64xf32>
    %c0_5 = arith.constant 0 : index
    %c0_6 = arith.constant 0 : index
    %5 = vector.load %arg4[%c0_5, %c0_6] : memref<1x64xf32, #tpu.memory_space<vmem>>, vector<1x64xf32>
    %6 = vector.broadcast %5 : vector<1x64xf32> to vector<256x64xf32>
    %7 = arith.addf %4, %6 : vector<256x64xf32>
    %cst_7 = arith.constant 0.000000e+00 : f32
    %8 = vector.broadcast %cst_7 : f32 to vector<256x64xf32>
    %9 = arith.maximumf %7, %8 : vector<256x64xf32>
    %10 = vector.shape_cast %9 : vector<256x64xf32> to vector<16x16x64xf32>
    %c0_8 = arith.constant 0 : index
    %c0_9 = arith.constant 0 : index
    %c0_10 = arith.constant 0 : index
    %c0_11 = arith.constant 0 : index
    %11 = vector.load %arg5[%c0_8, %c0_9, %c0_10, %c0_11] : memref<1x16x16x64xf32, #tpu.memory_space<vmem>>, vector<1x16x16x64xf32>
    %12 = vector.shape_cast %11 : vector<1x16x16x64xf32> to vector<16x16x64xf32>
    %13 = vector.shape_cast %10 : vector<16x16x64xf32> to vector<1x16x16x64xf32>
    tpu.vector_store %arg5[%c0_8, %c0_9, %c0_10, %c0_11], %13 {strides = array<i32>} : memref<1x16x16x64xf32, #tpu.memory_space<vmem>>, vector<1x16x16x64xf32>,
    return
  }
  func.func @transform_0(%arg0: i32, %arg1: i32) -> (i32, i32, i32, i32) {
    %c0_i32 = arith.constant 0 : i32
    %c0_i32_0 = arith.constant 0 : i32
    %c0_i32_1 = arith.constant 0 : i32
    return %arg0, %arg1, %c0_i32, %c0_i32_0 : i32, i32, i32, i32
  }
  func.func @transform_1(%arg0: i32, %arg1: i32) -> (i32, i32) {
    %c0_i32 = arith.constant 0 : i32
    %c0_i32_0 = arith.constant 0 : i32
    %c0_i32_1 = arith.constant 0 : i32
    return %c0_i32, %c0_i32_0 : i32, i32
  }
  func.func @transform_2(%arg0: i32, %arg1: i32) -> (i32, i32) {
    %c0_i32 = arith.constant 0 : i32
    %c0_i32_0 = arith.constant 0 : i32
    %c0_i32_1 = arith.constant 0 : i32
    return %c0_i32, %c0_i32_0 : i32, i32
  }
  func.func @transform_3(%arg0: i32, %arg1: i32) -> (i32, i32, i32, i32) {
    %c0_i32 = arith.constant 0 : i32
    %c0_i32_0 = arith.constant 0 : i32
    %c0_i32_1 = arith.constant 0 : i32
    return %arg0, %arg1, %c0_i32, %c0_i32_0 : i32, i32, i32, i32
  }
}

</mosaic_0001>

<bundles_post_ra>
// kernel: tpu_custom_call.1
= control target key start
LH: loop header
LB: loop body
LE: loop exit
PB: predicated region body
PF: predicated region fallthrough
CT: control target
= control target key end

     0   :  { %8 = vsyncpa [#allocation3], 0  ;;  %s1628_s0 = inlined_call_operand.hbm [shape: f32[2,16,16,243], index: 0, kind: input, shape index: {}]   ;;  %s1629_s1 = inlined_call_operand.vmem [shape: f32[243,64], index: 1, kind: input, shape index: {}]   ;;  %s1630_s2 = inlined_call_operand.vmem [shape: f32[1,64], index: 2, kind: input, shape index: {}]   ;;  %s1631_s3 = inlined_call_operand.hbm [shape: f32[2,16,16,64], index: 3, kind: output, shape index: {}]  }
   0x1   :  { %10 = vsyncpa [#allocation3 + $0x1], 0 }
   0x2   :  { %11 = vsyncpa [#allocation4], 0 }
   0x3   :  { %13 = vsyncpa [#allocation4 + $0x1], 0  ;;  %s1124_s12 = smov 0   ;;  %s1126_s13 = smov 0  }
   0x4   :  { %s1128_s14 = smov 0   ;;  %s1130_s15 = smov 0  }
   0x5   :  { %s1132_s16 = smov 0   ;;  %s1134_s17 = smov 0  }
   0x6 LB: > { %s807_s18 = sadd.s32 4294967295, %s1095_s17   ;;  %s808_s19 = sadd.s32 4294967294, %s1095_s17   ;;  %s1095_s17 = sphi %s1134_s17, %s19_s17   ;;  %s1091_s16 = sphi %s1132_s16, %s1642_s16   ;;  %s1087_s15 = sphi %s1130_s15, %s1641_s15   ;;  %s1083_s14 = sphi %s1128_s14, %s1640_s14   ;;  %s1079_s13 = sphi %s1126_s13, %s1639_s13   ;;  %s1075_s12 = sphi %s1124_s12, %s1638_s12  }
   0x7   : > { %s31_s20 = sadd.s32 1, %s1091_s16  ;;  %s40_s21 = sadd.s32 1, %s1083_s14 }
   0x8   : > { %p33_p0 = scmp.ge.s32.totalorder %s31_s20, 2  ;;  %p47_p1 = scmp.ne.s32.totalorder %s1083_s14, %s1079_s13 }
   0x9   : > { %p48_p2 = scmp.eq.s32.totalorder %s1095_s17, 0  ;;  %p53_p3 = scmp.ne.s32.totalorder %s1079_s13, %s1075_s12 }
   0xa   : > { %s1644_s20 = smov (%p33_p0, %s31_s20), 0  ;;  %p54_p5 = scmp.eq.s32.totalorder %s807_s18, 0 }
   0xb   : > { %p1165_p4 = por %p48_p2, %p47_p1  ;;  %s35_s23 = ssub.s32 %s1091_s16, %s1644_s20 }
   0xc   : > { %p121_p6 = scmp.eq.s32.totalorder %s807_s18, 1  ;;  %p38_p7 = scmp.eq.s32.totalorder %s35_s23, 0 }
   0xd   : > { %p1171_p8 = por %p54_p5, %p53_p3  ;;  %p127_p10 = scmp.eq.s32.totalorder %s808_s19, 1 }
   0xe   : > { %p1175_p9 = por %p121_p6, %p47_p1  ;;  %p932_p13 = scmp.lt.s32.totalorder %s1095_s17, 2 }
   0xf   : > { %s1180_s26 = scalar_select %p38_p7, %s1083_s14, %s40_s21  }
  0x10   : > { %p1182_p11 = por %p127_p10, %p53_p3  ;;  %s153_s28 = sand.u32 1, %s1083_s14  }
  0x11   : > { %s811_s29 = sshll.u32 %s153_s28, 9  ;;  %s856_s30 = sshll.u32 %s1091_s16, 13 }
  0x12   : > { %s166_s6 = scalar_lea.hbm %s1628_s0, %s856_s30  ;;  %s157_s7 = scalar_lea.vmem [#allocation2], %s811_s29 }
  0x13   : > { %s167_s8 = sshll.u32 %s157_s7, 4  ;;  %p1195_p0 = pnand %p932_p13, %p1165_p4  ;;  %s168_s8 = int_to_ptr.vmem [resolvable:$true] %s167_s8 }
  0x14   : > { %p814_p1 = scmp.ge.s32.totalorder %s1095_s17, 1  ;;  %s154_s10 = scalar_lea.sflag [#allocation3], %s153_s28 }
  0x15   : > { %p989_p2 = pneg %p1195_p0  ;;  %s1000_s11 = scalar_lea.vmem %s168_s8, 8192 }
  0x16   : > { %p1001_p3 = scmp.ne.s32.totalorder %s168_s8, %s1000_s11  ;;  %s1097_s18 = smov [#allocation2]  }
  0x17   : > { %s1005_s19 = sshll.u32 %s1097_s18, 4  ;;  %s1006_s19 = int_to_ptr.vmem [resolvable:$false] %s1005_s19 }
  0x18   : > { %p1003_p5 = pnand %p1001_p3, %p989_p2  ;;  %s1007_s21 = scalar_lea.vmem %s1006_s19, 16384 }
  0x19   : > { %p1008_p7 = scmp.lt.s32.totalorder %s168_s8, %s1006_s19  ;;  %p1009_p10 = scmp.lt.s32.totalorder %s1007_s21, %s1000_s11 }
  0x1a   : > { %p1004_p6 = pneg %p1003_p5 }
  0x1b   : > { %p1010_p12 = por %p1009_p10, %p1008_p7 }
  0x1d   : > { %p1011_p4 = pnand %p1010_p12, %p1004_p6 }
  0x1f   : > { %1014 = shalt.err (!%p1011_p4)
}
  0x20   : > { %s1098_s22 = smov 256   ;;  %s1099_s23 = smov 16  }
  0x21   : > { %927 = dma.hbm_to_vmem [thread:$0]  (!%p1195_p0), %s166_s6, 8192, %s168_s8, %s154_s10, %s1098_s22, %s1098_s22, %s1099_s23  }
  0x22   : > { %p175_p13 = scmp.lt.s32.totalorder %s1095_s17, 3 }
  0x24   : > { %p176_p2 = pnand %p814_p1, %p175_p13 }
  0x25   : > { %s1208_s28 = sand.u32 (!%p176_p2), 1, %s1079_s13  }
  0x26   : > { %179 = sbr.rel (%p176_p2) target bundleno = 379 (0x17b), region = 32  ;;  %s815_s29 = sshll.u32 (!%p176_p2), %s1208_s28, 9 }
  0x27   : > { %s182_s30 = scalar_lea.sflag (!%p176_p2), [#allocation3], %s1208_s28  ;;  %s1212_s4 = scalar_lea.vmem (!%p176_p2), [#allocation2], %s815_s29 }
  0x2b   : > { %1066 = dma.done.wait (%p1171_p8), %s182_s30, 8192  }
  0x2c   : > { %1068 = vsyncadd (%p1171_p8), %s182_s30, 4294959104  ;;  %v1100_v0 = vmov 0.0   ;;  %v289_v1 = vld [vmem:[%s1629_s1 + $0x78] sm:$0xff]  ;;  %v288_v2 = vld [vmem:[%s1629_s1 + $0x70] sm:$0xff]  ;;  %vm409_vm0 = vcmask 1042432   ;;  %vm312_vm1 = vcmask 941056  }
  0x2d   : > { %413 = vmatprep.subr.mxu0 %v1100_v0  ;;  %858 = vmatprep.subr.mxu1 %v1100_v0  ;;  %v287_v3 = vld [vmem:[%s1629_s1 + $0x68] sm:$0xff]  ;;  %v286_v4 = vld [vmem:[%s1629_s1 + $0x60] sm:$0xff]  ;;  %v285_v5 = vld [vmem:[%s1629_s1 + $0x58] sm:$0xff]  ;;  %s816_s24 = sshll.u32 %s1208_s28, 8  ;;  %vm670_vm2 = vcmask 523264   ;;  %s857_s9 = sshll.u32 %s1087_s15, 12 }
  0x2e   : > { %414 = vmatpush1.msra.mxu0 %v289_v1  ;;  %889 = vmatpush1.msra.mxu1 %v289_v1  ;;  %v284_v6 = vld [vmem:[%s1629_s1 + $0x50] sm:$0xff]  ;;  %v283_v7 = vld [vmem:[%s1629_s1 + $0x48] sm:$0xff]  ;;  %v282_v8 = vld [vmem:[%s1629_s1 + $0x40] sm:$0xff]  ;;  %s1574_s19 = scalar_lea.hbm %s1631_s3, %s857_s9  ;;  %s704_s15 = scalar_lea.sflag [#allocation4], %s1208_s28 }
  0x2f   : > { %415 = vmatprep.subr.mxu0 %v1100_v0  ;;  %859 = vmatprep.subr.mxu1 %v1100_v0  ;;  %v281_v9 = vld [vmem:[%s1629_s1 + $0x38] sm:$0xff]  ;;  %v280_v10 = vld [vmem:[%s1629_s1 + $0x30] sm:$0xff]  ;;  %v279_v11 = vld [vmem:[%s1629_s1 + $0x28] sm:$0xff]  ;;  %s1101_s22 = smov [#allocation5]  }
  0x30   : > { %416 = vmatpush1.msra.mxu0 %v288_v2  ;;  %890 = vmatpush1.msra.mxu1 %v288_v2  ;;  %v278_v12 = vld [vmem:[%s1629_s1 + $0x20] sm:$0xff]  ;;  %v277_v13 = vld [vmem:[%s1629_s1 + $0x18] sm:$0xff]  ;;  %v276_v14 = vld [vmem:[%s1629_s1 + $0x10] sm:$0xff]  ;;  %s1019_s23 = sshll.u32 %s1101_s22, 4  ;;  %s1020_s23 = int_to_ptr.vmem [resolvable:$false] %s1019_s23 }
  0x31   : > { %417 = vmatprep.subr.mxu0 %v1100_v0  ;;  %860 = vmatprep.subr.mxu1 %v1100_v0  ;;  %v275_v15 = vld [vmem:[%s1629_s1 + $0x8] sm:$0xff]  ;;  %v274_v16 = vld [vmem:[%s1629_s1] sm:$0xff]  ;;  %v304_v17 = vld [vmem:[%s1629_s1 + $0xf0] sm:$0x7]  ;;  %s1021_s29 = scalar_lea.vmem %s1020_s23, 8192 }
  0x32   : > { %418 = vmatpush1.msra.mxu0 %v287_v3  ;;  %891 = vmatpush1.msra.mxu1 %v287_v3  ;;  %v303_v18 = vld [vmem:[%s1629_s1 + $0xe8] sm:$0xff]  ;;  %v302_v19 = vld [vmem:[%s1629_s1 + $0xe0] sm:$0xff]  ;;  %v301_v20 = vld [vmem:[%s1629_s1 + $0xd8] sm:$0xff] }
  0x33   : > { %419 = vmatprep.subr.mxu0 %v1100_v0  ;;  %861 = vmatprep.subr.mxu1 %v1100_v0  ;;  %v300_v21 = vld [vmem:[%s1629_s1 + $0xd0] sm:$0xff]  ;;  %v299_v22 = vld [vmem:[%s1629_s1 + $0xc8] sm:$0xff]  ;;  %v298_v23 = vld [vmem:[%s1629_s1 + $0xc0] sm:$0xff] }
  0x34   : > { %420 = vmatpush1.msra.mxu0 %v286_v4  ;;  %892 = vmatpush1.msra.mxu1 %v286_v4  ;;  %v297_v24 = vld [vmem:[%s1629_s1 + $0xb8] sm:$0xff]  ;;  %v296_v25 = vld [vmem:[%s1629_s1 + $0xb0] sm:$0xff]  ;;  %v295_v26 = vld [vmem:[%s1629_s1 + $0xa8] sm:$0xff] }
  0x35   : > { %421 = vmatprep.subr.mxu0 %v1100_v0  ;;  %862 = vmatprep.subr.mxu1 %v1100_v0  ;;  %v294_v27 = vld [vmem:[%s1629_s1 + $0xa0] sm:$0xff]  ;;  %v293_v28 = vld [vmem:[%s1629_s1 + $0x98] sm:$0xff]  ;;  %v292_v29 = vld [vmem:[%s1629_s1 + $0x90] sm:$0xff] }
  0x36   : > { %422 = vmatpush1.msra.mxu0 %v285_v5  ;;  %893 = vmatpush1.msra.mxu1 %v285_v5  ;;  %v291_v30 = vld [vmem:[%s1629_s1 + $0x88] sm:$0xff]  ;;  %v290_v31 = vld [vmem:[%s1629_s1 + $0x80] sm:$0xff]  ;;  %v213_v36 = vld [vmem:[%s1212_s4 + $0x18] sm:$0xff] }
  0x37   : > { %423 = vmatprep.subr.mxu0 %v1100_v0  ;;  %863 = vmatprep.subr.mxu1 %v1100_v0  ;;  %v211_v32 = vld [vmem:[%s1212_s4 + $0x8] sm:$0xff]  ;;  %v210_v34 = vld [vmem:[%s1212_s4] sm:$0xff]  ;;  %v245_v37 = vld [vmem:[%s1212_s4 + $0x118] sm:$0xff] }
  0x38   : > { %424 = vmatpush1.msra.mxu0 %v284_v6  ;;  %894 = vmatpush1.msra.mxu1 %v284_v6  ;;  %v243_v33 = vld [vmem:[%s1212_s4 + $0x108] sm:$0xff]  ;;  %v242_v35 = vld [vmem:[%s1212_s4 + $0x100] sm:$0xff]  ;;  %v212_v38 = vld [vmem:[%s1212_s4 + $0x10] sm:$0xff] }
  0x39   : > { %425 = vmatprep.subr.mxu0 %v1100_v0  ;;  %864 = vmatprep.subr.mxu1 %v1100_v0  ;;  %v244_v39 = vld [vmem:[%s1212_s4 + $0x110] sm:$0xff]  ;;  %v215_v40 = vld [vmem:[%s1212_s4 + $0x28] sm:$0xff]  ;;  %v214_v42 = vld [vmem:[%s1212_s4 + $0x20] sm:$0xff] }
  0x3a   : > { %426 = vmatpush1.msra.mxu0 %v283_v7  ;;  %895 = vmatpush1.msra.mxu1 %v283_v7  ;;  %v247_v41 = vld [vmem:[%s1212_s4 + $0x128] sm:$0xff]  ;;  %v246_v43 = vld [vmem:[%s1212_s4 + $0x120] sm:$0xff]  ;;  %v217_v44 = vld [vmem:[%s1212_s4 + $0x38] sm:$0xff] }
  0x3b   : > { %427 = vmatprep.subr.mxu0 %v1100_v0  ;;  %865 = vmatprep.subr.mxu1 %v1100_v0  ;;  %v249_v45 = vld [vmem:[%s1212_s4 + $0x138] sm:$0xff]  ;;  %v216_v46 = vld [vmem:[%s1212_s4 + $0x30] sm:$0xff]  ;;  %v219_v48 = vld [vmem:[%s1212_s4 + $0x48] sm:$0xff] }
  0x3c   : > { %428 = vmatpush1.msra.mxu0 %v282_v8  ;;  %896 = vmatpush1.msra.mxu1 %v282_v8  ;;  %v248_v47 = vld [vmem:[%s1212_s4 + $0x130] sm:$0xff]  ;;  %v251_v49 = vld [vmem:[%s1212_s4 + $0x148] sm:$0xff]  ;;  %v218_v50 = vld [vmem:[%s1212_s4 + $0x40] sm:$0xff] }
  0x3d   : > { %429 = vmatprep.subr.mxu0 %v1100_v0  ;;  %866 = vmatprep.subr.mxu1 %v1100_v0  ;;  %v250_v51 = vld [vmem:[%s1212_s4 + $0x140] sm:$0xff]  ;;  %v221_v52 = vld [vmem:[%s1212_s4 + $0x58] sm:$0xff]  ;;  %v220_v54 = vld [vmem:[%s1212_s4 + $0x50] sm:$0xff] }
  0x3e   : > { %430 = vmatpush1.msra.mxu0 %v281_v9  ;;  %897 = vmatpush1.msra.mxu1 %v281_v9  ;;  %v253_v53 = vld [vmem:[%s1212_s4 + $0x158] sm:$0xff]  ;;  %v252_v55 = vld [vmem:[%s1212_s4 + $0x150] sm:$0xff]  ;;  %v223_v56 = vld [vmem:[%s1212_s4 + $0x68] sm:$0xff] }
  0x3f   : > { %431 = vmatprep.subr.mxu0 %v1100_v0  ;;  %867 = vmatprep.subr.mxu1 %v1100_v0  ;;  %v255_v57 = vld [vmem:[%s1212_s4 + $0x168] sm:$0xff]  ;;  %v222_v58 = vld [vmem:[%s1212_s4 + $0x60] sm:$0xff]  ;;  %v225_v60 = vld [vmem:[%s1212_s4 + $0x78] sm:$0xff] }
  0x40   : > { %432 = vmatpush1.msra.mxu0 %v280_v10  ;;  %898 = vmatpush1.msra.mxu1 %v280_v10  ;;  %v254_v59 = vld [vmem:[%s1212_s4 + $0x160] sm:$0xff]  ;;  %v257_v61 = vld [vmem:[%s1212_s4 + $0x178] sm:$0xff]  ;;  %v224_v62 = vld [vmem:[%s1212_s4 + $0x70] sm:$0xff] }
  0x41   : > { %433 = vmatprep.subr.mxu0 %v1100_v0  ;;  %868 = vmatprep.subr.mxu1 %v1100_v0  ;;  %v256_v63 = vld [vmem:[%s1212_s4 + $0x170] sm:$0xff]  ;;  %v259_v1 = vld [vmem:[%s1212_s4 + $0x188] sm:$0xff]  ;;  %v226_v2 = vld [vmem:[%s1212_s4 + $0x80] sm:$0xff] }
  0x42   : > { %434 = vmatpush1.msra.mxu0 %v279_v11  ;;  %899 = vmatpush1.msra.mxu1 %v279_v11  ;;  %v258_v3 = vld [vmem:[%s1212_s4 + $0x180] sm:$0xff]  ;;  %v229_v4 = vld [vmem:[%s1212_s4 + $0x98] sm:$0xff]  ;;  %v228_v6 = vld [vmem:[%s1212_s4 + $0x90] sm:$0xff] }
  0x43   : > { %435 = vmatprep.subr.mxu0 %v1100_v0  ;;  %869 = vmatprep.subr.mxu1 %v1100_v0  ;;  %v261_v5 = vld [vmem:[%s1212_s4 + $0x198] sm:$0xff]  ;;  %v260_v7 = vld [vmem:[%s1212_s4 + $0x190] sm:$0xff]  ;;  %v231_v8 = vld [vmem:[%s1212_s4 + $0xa8] sm:$0xff] }
  0x44   : > { %436 = vmatpush1.msra.mxu0 %v278_v12  ;;  %900 = vmatpush1.msra.mxu1 %v278_v12  ;;  %v263_v9 = vld [vmem:[%s1212_s4 + $0x1a8] sm:$0xff]  ;;  %v230_v10 = vld [vmem:[%s1212_s4 + $0xa0] sm:$0xff]  ;;  %v233_v12 = vld [vmem:[%s1212_s4 + $0xb8] sm:$0xff] }
  0x45   : > { %437 = vmatprep.subr.mxu0 %v1100_v0  ;;  %870 = vmatprep.subr.mxu1 %v1100_v0  ;;  %v262_v11 = vld [vmem:[%s1212_s4 + $0x1a0] sm:$0xff] }
  0x46   : > { %438 = vmatpush1.msra.mxu0 %v277_v13  ;;  %901 = vmatpush1.msra.mxu1 %v277_v13  ;;  %v265_v13 = vld [vmem:[%s1212_s4 + $0x1b8] sm:$0xff] }
  0x47   : > { %439 = vmatprep.subr.mxu0 %v1100_v0  ;;  %871 = vmatprep.subr.mxu1 %v1100_v0 }
  0x48   : > { %440 = vmatpush1.msra.mxu0 %v276_v14  ;;  %902 = vmatpush1.msra.mxu1 %v276_v14  ;;  %v232_v14 = vld [vmem:[%s1212_s4 + $0xb0] sm:$0xff] }
  0x49   : > { %441 = vmatprep.subr.mxu0 %v1100_v0  ;;  %872 = vmatprep.subr.mxu1 %v1100_v0 }
  0x4a   : > { %442 = vmatpush1.msra.mxu0 %v275_v15  ;;  %903 = vmatpush1.msra.mxu1 %v275_v15  ;;  %v264_v15 = vld [vmem:[%s1212_s4 + $0x1b0] sm:$0xff] }
  0x4b   : > { %443 = vmatprep.subr.mxu0 %v1100_v0  ;;  %873 = vmatprep.subr.mxu1 %v1100_v0 }
  0x4c   : > { %444 = vmatpush1.msra.mxu0 %v274_v16  ;;  %904 = vmatpush1.msra.mxu1 %v274_v16  ;;  %v235_v16 = vld [vmem:[%s1212_s4 + $0xc8] sm:$0xff] }
  0x4d   : > { %447 = vmatprep.subr.mxu0 %v1100_v0  ;;  %874 = vmatprep.subr.mxu1 %v1100_v0 }
  0x4e   : > { %818 = vmatpush2.msk.msra.mxu0 %vm409_vm0, %v304_v17  ;;  %905 = vmatpush2.msk.msra.mxu1 %vm409_vm0, %v304_v17  ;;  %v267_v17 = vld [vmem:[%s1212_s4 + $0x1c8] sm:$0xff] }
  0x4f   : > { %449 = vmatprep.subr.mxu0 %v1100_v0  ;;  %875 = vmatprep.subr.mxu1 %v1100_v0 }
  0x50   : > { %450 = vmatpush2.msra.mxu0 %v303_v18  ;;  %906 = vmatpush2.msra.mxu1 %v303_v18  ;;  %v234_v18 = vld [vmem:[%s1212_s4 + $0xc0] sm:$0xff] }
  0x51   : > { %451 = vmatprep.subr.mxu0 %v1100_v0  ;;  %876 = vmatprep.subr.mxu1 %v1100_v0 }
  0x52   : > { %452 = vmatpush2.msra.mxu0 %v302_v19  ;;  %907 = vmatpush2.msra.mxu1 %v302_v19  ;;  %v266_v19 = vld [vmem:[%s1212_s4 + $0x1c0] sm:$0xff] }
  0x53   : > { %453 = vmatprep.subr.mxu0 %v1100_v0  ;;  %877 = vmatprep.subr.mxu1 %v1100_v0 }
  0x54   : > { %454 = vmatpush2.msra.mxu0 %v301_v20  ;;  %908 = vmatpush2.msra.mxu1 %v301_v20  ;;  %v237_v20 = vld [vmem:[%s1212_s4 + $0xd8] sm:$0xff] }
  0x55   : > { %455 = vmatprep.subr.mxu0 %v1100_v0  ;;  %878 = vmatprep.subr.mxu1 %v1100_v0 }
  0x56   : > { %456 = vmatpush2.msra.mxu0 %v300_v21  ;;  %909 = vmatpush2.msra.mxu1 %v300_v21  ;;  %v269_v21 = vld [vmem:[%s1212_s4 + $0x1d8] sm:$0xff] }
  0x57   : > { %457 = vmatprep.subr.mxu0 %v1100_v0  ;;  %879 = vmatprep.subr.mxu1 %v1100_v0 }
  0x58   : > { %458 = vmatpush2.msra.mxu0 %v299_v22  ;;  %910 = vmatpush2.msra.mxu1 %v299_v22  ;;  %v236_v22 = vld [vmem:[%s1212_s4 + $0xd0] sm:$0xff] }
  0x59   : > { %459 = vmatprep.subr.mxu0 %v1100_v0  ;;  %880 = vmatprep.subr.mxu1 %v1100_v0 }
  0x5a   : > { %460 = vmatpush2.msra.mxu0 %v298_v23  ;;  %911 = vmatpush2.msra.mxu1 %v298_v23  ;;  %v268_v23 = vld [vmem:[%s1212_s4 + $0x1d0] sm:$0xff] }
  0x5b   : > { %461 = vmatprep.subr.mxu0 %v1100_v0  ;;  %881 = vmatprep.subr.mxu1 %v1100_v0 }
  0x5c   : > { %462 = vmatpush2.msra.mxu0 %v297_v24  ;;  %912 = vmatpush2.msra.mxu1 %v297_v24  ;;  %v239_v24 = vld [vmem:[%s1212_s4 + $0xe8] sm:$0xff] }
  0x5d   : > { %463 = vmatprep.subr.mxu0 %v1100_v0  ;;  %882 = vmatprep.subr.mxu1 %v1100_v0 }
  0x5e   : > { %464 = vmatpush2.msra.mxu0 %v296_v25  ;;  %913 = vmatpush2.msra.mxu1 %v296_v25  ;;  %v271_v25 = vld [vmem:[%s1212_s4 + $0x1e8] sm:$0xff] }
  0x5f   : > { %465 = vmatprep.subr.mxu0 %v1100_v0  ;;  %883 = vmatprep.subr.mxu1 %v1100_v0 }
  0x60   : > { %466 = vmatpush2.msra.mxu0 %v295_v26  ;;  %914 = vmatpush2.msra.mxu1 %v295_v26  ;;  %v238_v26 = vld [vmem:[%s1212_s4 + $0xe0] sm:$0xff] }
  0x61   : > { %467 = vmatprep.subr.mxu0 %v1100_v0  ;;  %884 = vmatprep.subr.mxu1 %v1100_v0 }
  0x62   : > { %468 = vmatpush2.msra.mxu0 %v294_v27  ;;  %915 = vmatpush2.msra.mxu1 %v294_v27  ;;  %v270_v27 = vld [vmem:[%s1212_s4 + $0x1e0] sm:$0xff] }
  0x63   : > { %469 = vmatprep.subr.mxu0 %v1100_v0  ;;  %885 = vmatprep.subr.mxu1 %v1100_v0 }
  0x64   : > { %470 = vmatpush2.msra.mxu0 %v293_v28  ;;  %916 = vmatpush2.msra.mxu1 %v293_v28  ;;  %v241_v28 = vld [vmem:[%s1212_s4 + $0xf8] sm:$0xff] }
  0x65   : > { %471 = vmatprep.subr.mxu0 %v1100_v0  ;;  %886 = vmatprep.subr.mxu1 %v1100_v0 }
  0x66   : > { %472 = vmatpush2.msra.mxu0 %v292_v29  ;;  %917 = vmatpush2.msra.mxu1 %v292_v29  ;;  %v273_v29 = vld [vmem:[%s1212_s4 + $0x1f8] sm:$0xff] }
  0x67   : > { %473 = vmatprep.subr.mxu0 %v1100_v0  ;;  %887 = vmatprep.subr.mxu1 %v1100_v0 }
  0x68   : > { %474 = vmatpush2.msra.mxu0 %v291_v30  ;;  %918 = vmatpush2.msra.mxu1 %v291_v30  ;;  %v240_v30 = vld [vmem:[%s1212_s4 + $0xf0] sm:$0xff] }
  0x69   : > { %475 = vmatprep.subr.mxu0 %v1100_v0  ;;  %888 = vmatprep.subr.mxu1 %v1100_v0  ;;  %v227_v0 = vld [vmem:[%s1212_s4 + $0x88] sm:$0xff] }
  0x6a   : > { %476 = vmatpush2.msra.mxu0 %v290_v31  ;;  %919 = vmatpush2.msra.mxu1 %v290_v31  ;;  %v272_v31 = vld [vmem:[%s1212_s4 + $0x1f0] sm:$0xff]  ;;  %s1477_s4 = scalar_lea.vmem [#allocation5], %s816_s24 }
  0x6b   : > { %819 = vmatprep.mubr.msk.f32.mxu0 %vm312_vm1, %v211_v32  ;;  %835 = vmatprep.mubr.msk.f32.mxu1 %vm312_vm1, %v243_v33  ;;  %v1472_v32 = vld [vmem:[%s1630_s2] ss:$0 sm:$0xff]  ;;  %s720_s10 = sshll.u32 %s1477_s4, 4  ;;  %s1576_s10 = int_to_ptr.vmem [resolvable:$true] %s720_s10 }
  0x6c   : > { %478 = vmatmul.mubr.f32.vlgmr.msra.gmra.mxu0 %v210_v34  ;;  %558 = vmatmul.mubr.f32.vlgmr.msra.gmra.mxu1 %v242_v35  ;;  %s1015_s21 = scalar_lea.vmem %s1576_s10, 4096  ;;  %p1022_p1 = scmp.lt.s32.totalorder %s1576_s10, %s1020_s23 }
  0x6d   : > { %820 = vmatprep.mubr.msk.f32.mxu0 %vm312_vm1, %v213_v36  ;;  %836 = vmatprep.mubr.msk.f32.mxu1 %vm312_vm1, %v245_v37  ;;  %p1016_p8 = scmp.ne.s32.totalorder %s1576_s10, %s1015_s21  ;;  %p1023_p3 = scmp.lt.s32.totalorder %s1021_s29, %s1015_s21 }
  0x6f   : > { %p1017_p12 = pnand %p1016_p8, %p1175_p9  ;;  %p1024_p5 = por %p1023_p3, %p1022_p1 }
  0x70   : > { %483 = vmatmul.mubr.f32.gmra.mxu0 %v212_v38  ;;  %563 = vmatmul.mubr.f32.gmra.mxu1 %v244_v39 }
  0x71   : > { %821 = vmatprep.mubr.msk.f32.mxu0 %vm312_vm1, %v215_v40  ;;  %837 = vmatprep.mubr.msk.f32.mxu1 %vm312_vm1, %v247_v41  ;;  %p1018_p0 = pneg %p1017_p12 }
  0x73   : > { %p1025_p6 = pnand %p1024_p5, %p1018_p0 }
  0x74   : > { %488 = vmatmul.mubr.f32.gmra.mxu0 %v214_v42  ;;  %568 = vmatmul.mubr.f32.gmra.mxu1 %v246_v43 }
  0x75   : > { %822 = vmatprep.mubr.msk.f32.mxu0 %vm312_vm1, %v217_v44  ;;  %838 = vmatprep.mubr.msk.f32.mxu1 %vm312_vm1, %v249_v45 }
  0x78   : > { %493 = vmatmul.mubr.f32.gmra.mxu0 %v216_v46  ;;  %573 = vmatmul.mubr.f32.gmra.mxu1 %v248_v47 }
  0x79   : > { %823 = vmatprep.mubr.msk.f32.mxu0 %vm312_vm1, %v219_v48  ;;  %839 = vmatprep.mubr.msk.f32.mxu1 %vm312_vm1, %v251_v49 }
  0x7c   : > { %498 = vmatmul.mubr.f32.gmra.mxu0 %v218_v50  ;;  %578 = vmatmul.mubr.f32.gmra.mxu1 %v250_v51 }
  0x7d   : > { %824 = vmatprep.mubr.msk.f32.mxu0 %vm312_vm1, %v221_v52  ;;  %840 = vmatprep.mubr.msk.f32.mxu1 %vm312_vm1, %v253_v53 }
  0x80   : > { %503 = vmatmul.mubr.f32.gmra.mxu0 %v220_v54  ;;  %583 = vmatmul.mubr.f32.gmra.mxu1 %v252_v55 }
  0x81   : > { %825 = vmatprep.mubr.msk.f32.mxu0 %vm312_vm1, %v223_v56  ;;  %841 = vmatprep.mubr.msk.f32.mxu1 %vm312_vm1, %v255_v57 }
  0x84   : > { %508 = vmatmul.mubr.f32.gmra.mxu0 %v222_v58  ;;  %588 = vmatmul.mubr.f32.gmra.mxu1 %v254_v59 }
  0x85   : > { %826 = vmatprep.mubr.msk.f32.mxu0 %vm312_vm1, %v225_v60  ;;  %842 = vmatprep.mubr.msk.f32.mxu1 %vm312_vm1, %v257_v61 }
  0x88   : > { %513 = vmatmul.mubr.f32.gmra.mxu0 %v224_v62  ;;  %593 = vmatmul.mubr.f32.gmra.mxu1 %v256_v63 }
  0x89   : > { %827 = vmatprep.mubr.msk.f32.mxu0 %vm312_vm1, %v227_v0  ;;  %843 = vmatprep.mubr.msk.f32.mxu1 %vm312_vm1, %v259_v1 }
  0x8c   : > { %518 = vmatmul.mubr.f32.gmra.mxu0 %v226_v2  ;;  %598 = vmatmul.mubr.f32.gmra.mxu1 %v258_v3 }
  0x8d   : > { %828 = vmatprep.mubr.msk.f32.mxu0 %vm312_vm1, %v229_v4  ;;  %844 = vmatprep.mubr.msk.f32.mxu1 %vm312_vm1, %v261_v5 }
  0x90   : > { %523 = vmatmul.mubr.f32.gmra.mxu0 %v228_v6  ;;  %603 = vmatmul.mubr.f32.gmra.mxu1 %v260_v7 }
  0x91   : > { %829 = vmatprep.mubr.msk.f32.mxu0 %vm312_vm1, %v231_v8  ;;  %845 = vmatprep.mubr.msk.f32.mxu1 %vm312_vm1, %v263_v9 }
  0x94   : > { %528 = vmatmul.mubr.f32.gmra.mxu0 %v230_v10  ;;  %608 = vmatmul.mubr.f32.gmra.mxu1 %v262_v11 }
  0x95   : > { %830 = vmatprep.mubr.msk.f32.mxu0 %vm312_vm1, %v233_v12  ;;  %846 = vmatprep.mubr.msk.f32.mxu1 %vm312_vm1, %v265_v13 }
  0x98   : > { %533 = vmatmul.mubr.f32.gmra.mxu0 %v232_v14  ;;  %613 = vmatmul.mubr.f32.gmra.mxu1 %v264_v15 }
  0x99   : > { %831 = vmatprep.mubr.msk.f32.mxu0 %vm312_vm1, %v235_v16  ;;  %847 = vmatprep.mubr.msk.f32.mxu1 %vm312_vm1, %v267_v17 }
  0x9c   : > { %538 = vmatmul.mubr.f32.gmra.mxu0 %v234_v18  ;;  %618 = vmatmul.mubr.f32.gmra.mxu1 %v266_v19 }
  0x9d   : > { %832 = vmatprep.mubr.msk.f32.mxu0 %vm312_vm1, %v237_v20  ;;  %848 = vmatprep.mubr.msk.f32.mxu1 %vm312_vm1, %v269_v21 }
  0xa0   : > { %543 = vmatmul.mubr.f32.gmra.mxu0 %v236_v22  ;;  %623 = vmatmul.mubr.f32.gmra.mxu1 %v268_v23 }
  0xa1   : > { %833 = vmatprep.mubr.msk.f32.mxu0 %vm312_vm1, %v239_v24  ;;  %849 = vmatprep.mubr.msk.f32.mxu1 %vm312_vm1, %v271_v25 }
  0xa4   : > { %548 = vmatmul.mubr.f32.gmra.mxu0 %v238_v26  ;;  %628 = vmatmul.mubr.f32.gmra.mxu1 %v270_v27 }
  0xa5   : > { %834 = vmatprep.mubr.msk.f32.mxu0 %vm312_vm1, %v241_v28  ;;  %850 = vmatprep.mubr.msk.f32.mxu1 %vm312_vm1, %v273_v29 }
  0xa8   : > { %553 = vmatmul.mubr.f32.gmra.mxu0 %v240_v30  ;;  %633 = vmatmul.mubr.f32.gmra.mxu1 %v272_v31 }
 0x12c   : > { %v479_v33 = vpop.f32.mrf.mxu0  ;;  %v559_v34 = vpop.f32.mrf.mxu1 }
 0x12d   : > { %v480_v35 = vadd.f32 %v1472_v32, %v479_v33  ;;  %v560_v36 = vadd.f32 %v1472_v32, %v559_v34 }
 0x12e   : > { %v481_v37 = vpop.f32.mrf.mxu0  ;;  %v561_v38 = vpop.f32.mrf.mxu1 }
 0x12f   : > { %v638_v39 = vmax.f32 %v480_v35, 0.0  ;;  %v654_v40 = vmax.f32 %v560_v36, 0.0 }
 0x130   : > { %v484_v41 = vpop.f32.mrf.mxu0  ;;  %v564_v42 = vpop.f32.mrf.mxu1 }
 0x131   : > { %671 = vst.msk [vmem:[%s1477_s4] sm:$0xff] %vm670_vm2, %v638_v39  ;;  %687 = vst.msk [vmem:[%s1477_s4 + $0x80] sm:$0xff] %vm670_vm2, %v654_v40  ;;  %v485_v43 = vadd.f32 %v1472_v32, %v484_v41  ;;  %v565_v44 = vadd.f32 %v1472_v32, %v564_v42 }
 0x132   : > { %v486_v45 = vpop.f32.mrf.mxu0  ;;  %v566_v46 = vpop.f32.mrf.mxu1 }
 0x133   : > { %v639_v47 = vmax.f32 %v485_v43, 0.0  ;;  %v655_v48 = vmax.f32 %v565_v44, 0.0 }
 0x134   : > { %v489_v49 = vpop.f32.mrf.mxu0  ;;  %v569_v50 = vpop.f32.mrf.mxu1 }
 0x135   : > { %672 = vst.msk [vmem:[%s1477_s4 + $0x8] sm:$0xff] %vm670_vm2, %v639_v47  ;;  %688 = vst.msk [vmem:[%s1477_s4 + $0x88] sm:$0xff] %vm670_vm2, %v655_v48  ;;  %v490_v51 = vadd.f32 %v1472_v32, %v489_v49  ;;  %v570_v52 = vadd.f32 %v1472_v32, %v569_v50 }
 0x136   : > { %v491_v53 = vpop.f32.mrf.mxu0  ;;  %v571_v54 = vpop.f32.mrf.mxu1 }
 0x137   : > { %v640_v55 = vmax.f32 %v490_v51, 0.0  ;;  %v656_v56 = vmax.f32 %v570_v52, 0.0 }
 0x138   : > { %v494_v57 = vpop.f32.mrf.mxu0  ;;  %v574_v58 = vpop.f32.mrf.mxu1 }
 0x139   : > { %673 = vst.msk [vmem:[%s1477_s4 + $0x10] sm:$0xff] %vm670_vm2, %v640_v55  ;;  %689 = vst.msk [vmem:[%s1477_s4 + $0x90] sm:$0xff] %vm670_vm2, %v656_v56  ;;  %v495_v59 = vadd.f32 %v1472_v32, %v494_v57  ;;  %v575_v60 = vadd.f32 %v1472_v32, %v574_v58 }
 0x13a   : > { %v496_v61 = vpop.f32.mrf.mxu0  ;;  %v576_v62 = vpop.f32.mrf.mxu1 }
 0x13b   : > { %v641_v63 = vmax.f32 %v495_v59, 0.0  ;;  %v657_v0 = vmax.f32 %v575_v60, 0.0 }
 0x13c   : > { %v499_v1 = vpop.f32.mrf.mxu0  ;;  %v579_v2 = vpop.f32.mrf.mxu1 }
 0x13d   : > { %674 = vst.msk [vmem:[%s1477_s4 + $0x18] sm:$0xff] %vm670_vm2, %v641_v63  ;;  %690 = vst.msk [vmem:[%s1477_s4 + $0x98] sm:$0xff] %vm670_vm2, %v657_v0  ;;  %v500_v3 = vadd.f32 %v1472_v32, %v499_v1  ;;  %v580_v4 = vadd.f32 %v1472_v32, %v579_v2 }
 0x13e   : > { %v501_v5 = vpop.f32.mrf.mxu0  ;;  %v581_v6 = vpop.f32.mrf.mxu1 }
 0x13f   : > { %v642_v7 = vmax.f32 %v500_v3, 0.0  ;;  %v658_v8 = vmax.f32 %v580_v4, 0.0 }
 0x140   : > { %v504_v9 = vpop.f32.mrf.mxu0  ;;  %v584_v10 = vpop.f32.mrf.mxu1 }
 0x141   : > { %675 = vst.msk [vmem:[%s1477_s4 + $0x20] sm:$0xff] %vm670_vm2, %v642_v7  ;;  %691 = vst.msk [vmem:[%s1477_s4 + $0xa0] sm:$0xff] %vm670_vm2, %v658_v8  ;;  %v505_v11 = vadd.f32 %v1472_v32, %v504_v9  ;;  %v585_v12 = vadd.f32 %v1472_v32, %v584_v10 }
 0x142   : > { %v506_v13 = vpop.f32.mrf.mxu0  ;;  %v586_v14 = vpop.f32.mrf.mxu1 }
 0x143   : > { %v643_v15 = vmax.f32 %v505_v11, 0.0  ;;  %v659_v16 = vmax.f32 %v585_v12, 0.0 }
 0x144   : > { %v509_v17 = vpop.f32.mrf.mxu0  ;;  %v589_v18 = vpop.f32.mrf.mxu1 }
 0x145   : > { %676 = vst.msk [vmem:[%s1477_s4 + $0x28] sm:$0xff] %vm670_vm2, %v643_v15  ;;  %692 = vst.msk [vmem:[%s1477_s4 + $0xa8] sm:$0xff] %vm670_vm2, %v659_v16  ;;  %v510_v19 = vadd.f32 %v1472_v32, %v509_v17  ;;  %v590_v20 = vadd.f32 %v1472_v32, %v589_v18 }
 0x146   : > { %v511_v21 = vpop.f32.mrf.mxu0  ;;  %v591_v22 = vpop.f32.mrf.mxu1 }
 0x147   : > { %v644_v23 = vmax.f32 %v510_v19, 0.0  ;;  %v660_v24 = vmax.f32 %v590_v20, 0.0 }
 0x148   : > { %v514_v25 = vpop.f32.mrf.mxu0  ;;  %v594_v26 = vpop.f32.mrf.mxu1 }
 0x149   : > { %677 = vst.msk [vmem:[%s1477_s4 + $0x30] sm:$0xff] %vm670_vm2, %v644_v23  ;;  %693 = vst.msk [vmem:[%s1477_s4 + $0xb0] sm:$0xff] %vm670_vm2, %v660_v24  ;;  %v515_v27 = vadd.f32 %v1472_v32, %v514_v25  ;;  %v595_v28 = vadd.f32 %v1472_v32, %v594_v26 }
 0x14a   : > { %v516_v29 = vpop.f32.mrf.mxu0  ;;  %v596_v30 = vpop.f32.mrf.mxu1 }
 0x14b   : > { %v645_v31 = vmax.f32 %v515_v27, 0.0  ;;  %v661_v33 = vmax.f32 %v595_v28, 0.0 }
 0x14c   : > { %v519_v34 = vpop.f32.mrf.mxu0  ;;  %v599_v35 = vpop.f32.mrf.mxu1 }
 0x14d   : > { %678 = vst.msk [vmem:[%s1477_s4 + $0x38] sm:$0xff] %vm670_vm2, %v645_v31  ;;  %694 = vst.msk [vmem:[%s1477_s4 + $0xb8] sm:$0xff] %vm670_vm2, %v661_v33  ;;  %v520_v36 = vadd.f32 %v1472_v32, %v519_v34  ;;  %v600_v37 = vadd.f32 %v1472_v32, %v599_v35 }
 0x14e   : > { %v521_v38 = vpop.f32.mrf.mxu0  ;;  %v601_v39 = vpop.f32.mrf.mxu1 }
 0x14f   : > { %v646_v40 = vmax.f32 %v520_v36, 0.0  ;;  %v662_v41 = vmax.f32 %v600_v37, 0.0 }
 0x150   : > { %v524_v42 = vpop.f32.mrf.mxu0  ;;  %v604_v43 = vpop.f32.mrf.mxu1 }
 0x151   : > { %679 = vst.msk [vmem:[%s1477_s4 + $0x40] sm:$0xff] %vm670_vm2, %v646_v40  ;;  %695 = vst.msk [vmem:[%s1477_s4 + $0xc0] sm:$0xff] %vm670_vm2, %v662_v41  ;;  %v525_v44 = vadd.f32 %v1472_v32, %v524_v42  ;;  %v605_v45 = vadd.f32 %v1472_v32, %v604_v43 }
 0x152   : > { %v526_v46 = vpop.f32.mrf.mxu0  ;;  %v606_v47 = vpop.f32.mrf.mxu1 }
 0x153   : > { %v647_v48 = vmax.f32 %v525_v44, 0.0  ;;  %v663_v49 = vmax.f32 %v605_v45, 0.0 }
 0x154   : > { %v529_v50 = vpop.f32.mrf.mxu0  ;;  %v609_v51 = vpop.f32.mrf.mxu1 }
 0x155   : > { %680 = vst.msk [vmem:[%s1477_s4 + $0x48] sm:$0xff] %vm670_vm2, %v647_v48  ;;  %696 = vst.msk [vmem:[%s1477_s4 + $0xc8] sm:$0xff] %vm670_vm2, %v663_v49  ;;  %v530_v52 = vadd.f32 %v1472_v32, %v529_v50  ;;  %v610_v53 = vadd.f32 %v1472_v32, %v609_v51 }
 0x156   : > { %v531_v54 = vpop.f32.mrf.mxu0  ;;  %v611_v55 = vpop.f32.mrf.mxu1 }
 0x157   : > { %v648_v56 = vmax.f32 %v530_v52, 0.0  ;;  %v664_v57 = vmax.f32 %v610_v53, 0.0 }
 0x158   : > { %v534_v58 = vpop.f32.mrf.mxu0  ;;  %v614_v59 = vpop.f32.mrf.mxu1 }
 0x159   : > { %681 = vst.msk [vmem:[%s1477_s4 + $0x50] sm:$0xff] %vm670_vm2, %v648_v56  ;;  %697 = vst.msk [vmem:[%s1477_s4 + $0xd0] sm:$0xff] %vm670_vm2, %v664_v57  ;;  %v535_v60 = vadd.f32 %v1472_v32, %v534_v58  ;;  %v615_v61 = vadd.f32 %v1472_v32, %v614_v59 }
 0x15a   : > { %v536_v62 = vpop.f32.mrf.mxu0  ;;  %v616_v63 = vpop.f32.mrf.mxu1 }
 0x15b   : > { %v649_v0 = vmax.f32 %v535_v60, 0.0  ;;  %v665_v1 = vmax.f32 %v615_v61, 0.0 }
 0x15c   : > { %v539_v2 = vpop.f32.mrf.mxu0  ;;  %v619_v3 = vpop.f32.mrf.mxu1 }
 0x15d   : > { %682 = vst.msk [vmem:[%s1477_s4 + $0x58] sm:$0xff] %vm670_vm2, %v649_v0  ;;  %698 = vst.msk [vmem:[%s1477_s4 + $0xd8] sm:$0xff] %vm670_vm2, %v665_v1  ;;  %v540_v4 = vadd.f32 %v1472_v32, %v539_v2  ;;  %v620_v5 = vadd.f32 %v1472_v32, %v619_v3 }
 0x15e   : > { %v541_v6 = vpop.f32.mrf.mxu0  ;;  %v621_v7 = vpop.f32.mrf.mxu1 }
 0x15f   : > { %v650_v8 = vmax.f32 %v540_v4, 0.0  ;;  %v666_v9 = vmax.f32 %v620_v5, 0.0 }
 0x160   : > { %v544_v10 = vpop.f32.mrf.mxu0  ;;  %v624_v11 = vpop.f32.mrf.mxu1 }
 0x161   : > { %683 = vst.msk [vmem:[%s1477_s4 + $0x60] sm:$0xff] %vm670_vm2, %v650_v8  ;;  %699 = vst.msk [vmem:[%s1477_s4 + $0xe0] sm:$0xff] %vm670_vm2, %v666_v9  ;;  %v545_v12 = vadd.f32 %v1472_v32, %v544_v10  ;;  %v625_v13 = vadd.f32 %v1472_v32, %v624_v11 }
 0x162   : > { %v546_v14 = vpop.f32.mrf.mxu0  ;;  %v626_v15 = vpop.f32.mrf.mxu1 }
 0x163   : > { %v651_v16 = vmax.f32 %v545_v12, 0.0  ;;  %v667_v17 = vmax.f32 %v625_v13, 0.0 }
 0x164   : > { %v549_v18 = vpop.f32.mrf.mxu0  ;;  %v629_v19 = vpop.f32.mrf.mxu1 }
 0x165   : > { %684 = vst.msk [vmem:[%s1477_s4 + $0x68] sm:$0xff] %vm670_vm2, %v651_v16  ;;  %700 = vst.msk [vmem:[%s1477_s4 + $0xe8] sm:$0xff] %vm670_vm2, %v667_v17  ;;  %v550_v20 = vadd.f32 %v1472_v32, %v549_v18  ;;  %v630_v21 = vadd.f32 %v1472_v32, %v629_v19 }
 0x166   : > { %v551_v22 = vpop.f32.mrf.mxu0  ;;  %v631_v23 = vpop.f32.mrf.mxu1 }
 0x167   : > { %v652_v24 = vmax.f32 %v550_v20, 0.0  ;;  %v668_v25 = vmax.f32 %v630_v21, 0.0 }
 0x168   : > { %v554_v26 = vpop.f32.mrf.mxu0  ;;  %v634_v27 = vpop.f32.mrf.mxu1 }
 0x169   : > { %685 = vst.msk [vmem:[%s1477_s4 + $0x70] sm:$0xff] %vm670_vm2, %v652_v24  ;;  %701 = vst.msk [vmem:[%s1477_s4 + $0xf0] sm:$0xff] %vm670_vm2, %v668_v25  ;;  %v555_v28 = vadd.f32 %v1472_v32, %v554_v26  ;;  %v635_v29 = vadd.f32 %v1472_v32, %v634_v27 }
 0x16a   : > { %v556_v30 = vpop.f32.mrf.mxu0  ;;  %v636_v31 = vpop.f32.mrf.mxu1 }
 0x16b   : > { %v653_v33 = vmax.f32 %v555_v28, 0.0  ;;  %v669_v34 = vmax.f32 %v635_v29, 0.0 }
 0x16d   : > { %686 = vst.msk [vmem:[%s1477_s4 + $0x78] sm:$0xff] %vm670_vm2, %v653_v33  ;;  %702 = vst.msk [vmem:[%s1477_s4 + $0xf8] sm:$0xff] %vm670_vm2, %v669_v34 }
 0x16e   : > { %1028 = shalt.err (!%p1025_p6)
}
 0x16f   : > { %s1029_s30 = scalar_lea.hbm %s1574_s19, 4096  ;;  %s1033_s7 = scalar_lea.hbm %s1631_s3, 8192 }
 0x170   : > { %p1030_p7 = scmp.ne.s32.totalorder %s1574_s19, %s1029_s30  ;;  %p1034_p13 = scmp.lt.s32.totalorder %s1574_s19, %s1631_s3 }
 0x171   : > { %p1035_p2 = scmp.lt.s32.totalorder %s1033_s7, %s1029_s30 }
 0x172   : > { %p1031_p10 = pnand %p1030_p7, %p1175_p9 }
 0x173   : > { %p1036_p8 = por %p1035_p2, %p1034_p13 }
 0x174   : > { %p1032_p4 = pneg %p1031_p10 }
 0x176   : > { %p1037_p12 = pnand %p1036_p8, %p1032_p4 }
 0x178   : > { %1040 = shalt.err (!%p1037_p12)
}
 0x179   : > { %s1102_s4 = smov 128   ;;  %s1103_s9 = smov 8  }
 0x17a   : > { %922 = dma.vmem_to_hbm [thread:$0]  (%p1175_p9), %s1576_s10, 4096, %s1574_s19, %s704_s15, %s1102_s4, %s1102_s4, %s1103_s9  }
 0x17b PF: > { %s735_s11 = sand.u32 1, %s1075_s12   ;;  %p1637_p0 = scmp.ge.s32.totalorder %s1095_s17, 2 }
 0x17c   : > { %s736_s18 = scalar_lea.sflag [#allocation4], %s735_s11 }
 0x17d   : > { %p929_p1 = pnand %p1637_p0, %p1182_p11 }
 0x17f   : > { %p930_p3 = pneg %p929_p1 }
 0x181   : > { %1070 = dma.done.wait (%p930_p3), %s736_s18, 4096  }
 0x182   : > { %1072 = vsyncadd (%p930_p3), %s736_s18, 4294963200  ;;  %s19_s17 = sadd.s32 1, %s1095_s17   ;;  %s1638_s12 = smov %s1079_s13 }
 0x183   : > { %p16_p5 = scmp.ge.s32.totalorder %s19_s17, 4   ;;  %s1639_s13 = smov %s1083_s14 }
 0x184   : > { %s1640_s14 = smov %s1180_s26  ;;  %s1641_s15 = smov %s1091_s16 }
 0x185   : > { %s1642_s16 = smov %s1644_s20  ;;  %18 = sbr.rel (!%p16_p5) target bundleno = 6 (0x6), region = 77 }
 0x18a   :  { %741 = vsyncpa [#allocation3], 1 }
 0x18b   :  { %743 = vsyncpa [#allocation3 + $0x1], 1 }
 0x18c   :  { %744 = vsyncpa [#allocation4], 1 }
 0x18d   :  { %746 = vsyncpa [#allocation4 + $0x1], 1 }

</bundles_post_ra>
